<compile_context>
chip_gen: v5e
topology: v5e:2x2
jax: 0.10.0
libtpu: 0.0.40
codegen_flags: <defaults>
</compile_context>

<pallas_src>
import jax
import jax.numpy as jnp
from jax.experimental import pallas as pl
from jax.experimental.pallas import tpu as pltpu

LANE = 128     # vreg / MXU lane width
SUBLANE = 8    # f32 sublane count


def _round_up(x, m):
    return ((x + m - 1) // m) * m


def _tpu_info():
    """Return (vmem_capacity_bytes, num_tensorcores_per_chip) with fallbacks."""
    vmem_cap = 128 * 1024 * 1024   # v5e / v6e physical VMEM
    num_tc = 1
    kind = ""
    try:
        kind = jax.devices()[0].device_kind.lower()
    except Exception:
        pass
    if "7" in kind:                # v7x: 64 MiB VMEM per TC, 2 TCs per chip
        vmem_cap = 64 * 1024 * 1024
        num_tc = 2
    try:
        vmem_cap = int(pltpu.get_tpu_info().vmem_capacity_bytes)
    except Exception:
        pass
    return vmem_cap, num_tc


def _mlp_kernel(x_ref, w1_ref, b1_ref, w2_ref, b2_ref, o_ref, acc_ref):
    # Grid: (batch tiles [parallel], hidden chunks [arbitrary reduction]).
    # x_ref:  (tile_b, in_p)     compute dtype (bf16 or f32)
    # w1_ref: (in_p, tile_h)     compute dtype
    # b1_ref: (1, tile_h)        f32
    # w2_ref: (tile_h, out_p)    compute dtype
    # b2_ref: (1, out_p)         f32
    # o_ref:  (tile_b, out_p)    output dtype
    # acc_ref:(tile_b, out_p)    f32 scratch (resident across the k axis)
    k = pl.program_id(1)

    @pl.when(k == 0)
    def _():
        acc_ref[...] = jnp.zeros_like(acc_ref)

    # fc1 chunk on the MXU (f32 accumulate); bias add + ReLU stay f32 on VPU.
    h = jnp.dot(x_ref[...], w1_ref[...], preferred_element_type=jnp.float32)
    h = jnp.maximum(h + b1_ref[...], 0.0)
    # fc2 chunk, accumulated into the resident f32 accumulator.
    acc_ref[...] += jnp.dot(h.astype(w2_ref.dtype), w2_ref[...],
                            preferred_element_type=jnp.float32)

    @pl.when(k == pl.num_programs(1) - 1)
    def _():
        o_ref[...] = (acc_ref[...] + b2_ref[...]).astype(o_ref.dtype)


def prepare_params(w1, b1, w2, b2, *, compute_dtype=jnp.bfloat16,
                   tile_h=None, vmem_limit_bytes=None):
    """Pad/cast the Linear params once (hoisted out of the per-call path).

    w1: (input_size, hidden_size), b1: (hidden_size,)
    w2: (hidden_size, num_classes), b2: (num_classes,)
    compute_dtype: MXU operand dtype (bf16 default); accumulation stays f32.
    """
    input_size, hidden_size = w1.shape
    num_classes = w2.shape[1]
    cdtype = jnp.dtype(compute_dtype)

    vmem_cap, num_tc = _tpu_info()
    if vmem_limit_bytes is None:
        # ~75% of physical VMEM: ~96 MiB on v5e/v6e, ~48 MiB on v7x.
        vmem_limit_bytes = int(vmem_cap * 3 // 4)

    in_p = _round_up(input_size, LANE)
    hid_p = _round_up(hidden_size, LANE)
    out_p = _round_up(num_classes, LANE)
    xb = cdtype.itemsize

    def weight_step_bytes(th):
        # One hidden-chunk worth of weight/bias blocks; x2 because inputs
        # (even with a constant block index) get two pipeline buffers.
        return 2 * (in_p * th * xb + th * 4 + th * out_p * xb + out_p * 4)

    if tile_h is None:
        # Keep weights fully resident when they fit ~40% of the VMEM budget;
        # otherwise tile the hidden (reduction) dimension.
        tile_h = hid_p
        w_budget = int(vmem_limit_bytes * 0.4)
        while tile_h > LANE and weight_step_bytes(tile_h) > w_budget:
            tile_h = max(LANE, _round_up(tile_h // 2, LANE))
    tile_h = max(LANE, _round_up(int(tile_h), LANE))
    tile_h = min(tile_h, hid_p)
    hid_p = _round_up(hid_p, tile_h)   # tile_h must divide the padded hidden dim

    f32 = jnp.float32
    # Zero padding is semantics-preserving: padded hidden columns get bias 0
    # -> relu(0) = 0 and zero w2 rows, so they contribute nothing; padded
    # input columns see zero x and zero w1 rows; padded output columns are
    # sliced away in the wrapper.
    w1_p = jnp.zeros((in_p, hid_p), cdtype).at[:input_size, :hidden_size].set(
        w1.astype(cdtype))
    b1_p = jnp.zeros((1, hid_p), f32).at[0, :hidden_size].set(b1.astype(f32))
    w2_p = jnp.zeros((hid_p, out_p), cdtype).at[:hidden_size, :num_classes].set(
        w2.astype(cdtype))
    b2_p = jnp.zeros((1, out_p), f32).at[0, :num_classes].set(b2.astype(f32))

    return dict(
        w1=w1_p, b1=b1_p, w2=w2_p, b2=b2_p,
        input_size=input_size, hidden_size=hidden_size, num_classes=num_classes,
        in_p=in_p, hid_p=hid_p, out_p=out_p, tile_h=tile_h,
        cdtype=cdtype, vmem_limit_bytes=int(vmem_limit_bytes), num_tc=num_tc,
        weight_step_bytes=weight_step_bytes(tile_h),
    )


def barebones_forward(x, params, *, tile_b=None):
    """scores = fc2(relu(fc1(x))) using the prepared / padded params."""
    B, input_size = x.shape
    assert input_size == params["input_size"], "input feature mismatch"

    in_p, hid_p, out_p = params["in_p"], params["hid_p"], params["out_p"]
    tile_h = params["tile_h"]
    num_classes = params["num_classes"]
    cdtype = params["cdtype"]
    vmem_limit_bytes = params["vmem_limit_bytes"]
    num_tc = params["num_tc"]

    out_dtype = x.dtype
    xb = cdtype.itemsize
    ob = jnp.dtype(out_dtype).itemsize

    if tile_b is None:
        # Per-row VMEM use per batch tile: double-buffered x / out streams,
        # the f32 fc1 intermediate (+ its compute-dtype copy for fc2), and
        # the f32 accumulator scratch.
        budget = vmem_limit_bytes - params["weight_step_bytes"]
        per_row = (2 * in_p * xb          # x stream (2 buffers)
                   + 2 * out_p * ob       # out stream (2 buffers)
                   + tile_h * (4 + xb)    # fc1 intermediate h (+ cast copy)
                   + out_p * 4)           # f32 accumulator
        tile_b = 1024
        while tile_b > SUBLANE and tile_b * per_row > budget:
            tile_b //= 2
        tile_b = max(tile_b, SUBLANE)
        # Never pad a small batch up to a huge tile.
        tile_b = min(tile_b, _round_up(B, SUBLANE))
        if num_tc >= 2 and B > SUBLANE:
            # Only chips with 2 TensorCores benefit from >= 2 "parallel" steps;
            # on v5e/v6e the grid is a sequential loop, so keep the big tile.
            half_b = _round_up(-(-B // 2), SUBLANE)
            tile_b = min(tile_b, half_b)
    tile_b = max(SUBLANE, _round_up(int(tile_b), SUBLANE))

    b_p = _round_up(B, tile_b)
    n_b = b_p // tile_b
    n_k = hid_p // tile_h

    # Fast path: skip the activation pad/copy when already aligned + cast.
    if b_p == B and in_p == input_size and x.dtype == cdtype:
        x_in = x
    else:
        x_in = jnp.zeros((b_p, in_p), cdtype).at[:B, :input_size].set(
            x.astype(cdtype))

    # Weights are fetched once when fully resident (n_k == 1), otherwise
    # re-streamed once per batch tile.
    w_reads = 1 if n_k == 1 else n_b
    cost = pl.CostEstimate(
        flops=2 * b_p * hid_p * (in_p + out_p),
        transcendentals=0,
        bytes_accessed=(b_p * in_p * xb
                        + b_p * out_p * ob
                        + w_reads * (in_p * hid_p * xb + hid_p * 4
                                     + hid_p * out_p * xb + out_p * 4)),
    )

    out_padded = pl.pallas_call(
        _mlp_kernel,
        out_shape=jax.ShapeDtypeStruct((b_p, out_p), out_dtype),
        grid_spec=pltpu.PrefetchScalarGridSpec(
            num_scalar_prefetch=0,
            grid=(n_b, n_k),
            in_specs=[
                # Streamed activations: one batch row-block, constant across k.
                pl.BlockSpec((tile_b, in_p), lambda i, k: (i, 0)),
                # fc1 weight / bias: one hidden chunk per k step. When
                # tile_h == hid_p the block index is constant -> fetched once
                # and kept resident in VMEM across the whole grid.
                pl.BlockSpec((in_p, tile_h), lambda i, k: (0, k)),
                pl.BlockSpec((1, tile_h), lambda i, k: (0, k)),
                # fc2 weight chunk and (full, lane-padded) bias.
                pl.BlockSpec((tile_h, out_p), lambda i, k: (k, 0)),
                pl.BlockSpec((1, out_p), lambda i, k: (0, 0)),
            ],
            # Lane-dense output block, resident across the reduction axis.
            out_specs=pl.BlockSpec((tile_b, out_p), lambda i, k: (i, 0)),
            scratch_shapes=[pltpu.VMEM((tile_b, out_p), jnp.float32)],
        ),
        compiler_params=pltpu.CompilerParams(
            dimension_semantics=("parallel", "arbitrary"),
            vmem_limit_bytes=vmem_limit_bytes,
        ),
        cost_estimate=cost,
    )(x_in, params["w1"], params["b1"], params["w2"], params["b2"])

    if b_p == B and out_p == num_classes:
        return out_padded
    return out_padded[:B, :num_classes]


def _ref_forward(x, w1, b1, w2, b2):
    h = jnp.maximum(x @ w1 + b1, 0.0)
    return h @ w2 + b2


if __name__ == "__main__":
    key = jax.random.PRNGKey(0)
    kx, kw1, kb1, kw2, kb2, kw3, kb3, kw4, kb4 = jax.random.split(key, 9)

    # Small shapes consistent with the module: Linear(input_size, hidden),
    # Linear(hidden, num_classes) applied to a (batch, input_size) tensor.
    batch, input_size, hidden_size, num_classes = 8, 32, 64, 16
    x = jax.random.normal(kx, (batch, input_size), dtype=jnp.float32)

    # PyTorch nn.Linear stores W as (out, in); build that way, transpose to (in, out).
    w1 = (jax.random.uniform(kw1, (hidden_size, input_size), minval=-1.0, maxval=1.0)
          / jnp.sqrt(input_size)).T.astype(jnp.float32)
    b1 = (jax.random.uniform(kb1, (hidden_size,), minval=-1.0, maxval=1.0)
          / jnp.sqrt(input_size)).astype(jnp.float32)
    w2 = (jax.random.uniform(kw2, (num_classes, hidden_size), minval=-1.0, maxval=1.0)
          / jnp.sqrt(hidden_size)).T.astype(jnp.float32)
    b2 = (jax.random.uniform(kb2, (num_classes,), minval=-1.0, maxval=1.0)
          / jnp.sqrt(hidden_size)).astype(jnp.float32)

    ref = _ref_forward(x, w1, b1, w2, b2)

    # 1) f32 MXU operands — tight tolerance.
    params_f32 = prepare_params(w1, b1, w2, b2, compute_dtype=jnp.float32)
    out = jax.block_until_ready(barebones_forward(x, params_f32))
    assert out.shape == (batch, num_classes)
    assert jnp.allclose(out, ref, atol=1e-5, rtol=1e-5)

    # 2) default bf16 MXU operands (f32 accumulate / bias / ReLU) — looser tol.
    params_bf16 = prepare_params(w1, b1, w2, b2)
    out_bf16 = jax.block_until_ready(barebones_forward(x, params_bf16))
    assert out_bf16.shape == (batch, num_classes)
    assert jnp.allclose(out_bf16, ref, atol=1e-1, rtol=1e-1)

    # 3) Batch not a multiple of the tile: exercises cdiv-style grid + padding.
    x_odd = jax.random.normal(kx, (12, input_size), dtype=jnp.float32)
    out_odd = jax.block_until_ready(barebones_forward(x_odd, params_f32, tile_b=8))
    assert out_odd.shape == (12, num_classes)
    assert jnp.allclose(out_odd, _ref_forward(x_odd, w1, b1, w2, b2),
                        atol=1e-5, rtol=1e-5)

    # 4) Hidden-dim (reduction) tiling fallback path: hidden=256, tile_h=128
    #    -> 2 k-steps with the f32 accumulator + pl.when init/finalize.
    hidden2 = 256
    w1b = (jax.random.uniform(kw3, (hidden2, input_size), minval=-1.0, maxval=1.0)
           / jnp.sqrt(input_size)).T.astype(jnp.float32)
    b1b = (jax.random.uniform(kb3, (hidden2,), minval=-1.0, maxval=1.0)
           / jnp.sqrt(input_size)).astype(jnp.float32)
    w2b = (jax.random.uniform(kw4, (num_classes, hidden2), minval=-1.0, maxval=1.0)
           / jnp.sqrt(hidden2)).T.astype(jnp.float32)
    b2b = (jax.random.uniform(kb4, (num_classes,), minval=-1.0, maxval=1.0)
           / jnp.sqrt(hidden2)).astype(jnp.float32)
    params_ht = prepare_params(w1b, b1b, w2b, b2b,
                               compute_dtype=jnp.float32, tile_h=128)
    out_ht = jax.block_until_ready(barebones_forward(x, params_ht))
    assert out_ht.shape == (batch, num_classes)
    assert jnp.allclose(out_ht, _ref_forward(x, w1b, b1b, w2b, b2b),
                        atol=1e-4, rtol=1e-4)

    print("KERNEL_OK")
</pallas_src>

<mosaic_0001>
module attributes {stable_mosaic.version = 11 : i64} {
  func.func @_mlp_kernel(%arg0: i32, %arg1: i32, %arg2: memref<8x128xf32, #tpu.memory_space<vmem>>, %arg3: memref<128x128xf32, #tpu.memory_space<vmem>>, %arg4: memref<1x128xf32, #tpu.memory_space<vmem>>, %arg5: memref<128x128xf32, #tpu.memory_space<vmem>>, %arg6: memref<1x128xf32, #tpu.memory_space<vmem>>, %arg7: memref<8x128xf32, #tpu.memory_space<vmem>>, %arg8: memref<8x128xf32, #tpu.memory_space<vmem>>) attributes {dimension_semantics = [#tpu.dimension_semantics<parallel>, #tpu.dimension_semantics<arbitrary>], iteration_bounds = array<i64: 1, 1>, scalar_prefetch = 0 : i64, scratch_operands = 1 : i64, tpu.core_type = #tpu.core_type<tc>, window_params = [{transform_indices = @transform_0, window_bounds = array<i64: 8, 128>}, {transform_indices = @transform_1, window_bounds = array<i64: 128, 128>}, {transform_indices = @transform_2, window_bounds = array<i64: 1, 128>}, {transform_indices = @transform_3, window_bounds = array<i64: 128, 128>}, {pipeline_mode = #tpu.pipeline_mode<synchronous>, transform_indices = @transform_4, window_bounds = array<i64: 1, 128>}, {transform_indices = @transform_5, window_bounds = array<i64: 8, 128>}]} {
    %c0_i32 = arith.constant 0 : i32
    %0 = arith.cmpi eq, %arg1, %c0_i32 : i32
    %1 = arith.extui %0 : i1 to i32
    %c0_i32_0 = arith.constant 0 : i32
    %2 = arith.cmpi ne, %1, %c0_i32_0 : i32
    scf.if %2 {
      %cst_16 = arith.constant 0.000000e+00 : f32
      %19 = vector.broadcast %cst_16 : f32 to vector<8x128xf32>
      %c0_17 = arith.constant 0 : index
      %c0_18 = arith.constant 0 : index
      %20 = vector.load %arg8[%c0_17, %c0_18] : memref<8x128xf32, #tpu.memory_space<vmem>>, vector<8x128xf32>
      tpu.vector_store %arg8[%c0_17, %c0_18], %19 {strides = array<i32>} : memref<8x128xf32, #tpu.memory_space<vmem>>, vector<8x128xf32>,
    } else {
    }
    %c0 = arith.constant 0 : index
    %c0_1 = arith.constant 0 : index
    %3 = vector.load %arg2[%c0, %c0_1] : memref<8x128xf32, #tpu.memory_space<vmem>>, vector<8x128xf32>
    %c0_2 = arith.constant 0 : index
    %c0_3 = arith.constant 0 : index
    %4 = vector.load %arg3[%c0_2, %c0_3] : memref<128x128xf32, #tpu.memory_space<vmem>>, vector<128x128xf32>
    %cst = arith.constant dense<0.000000e+00> : vector<8x128xf32>
    %5 = tpu.matmul %3, %4, %cst {dimension_numbers = #tpu.dot_dimension_numbers<[1], [0], [0], [1], [0, 0, 1, 1], [], []>} : vector<8x128xf32>, vector<128x128xf32>, vector<8x128xf32> -> vector<8x128xf32>
    %c0_4 = arith.constant 0 : index
    %c0_5 = arith.constant 0 : index
    %6 = vector.load %arg4[%c0_4, %c0_5] : memref<1x128xf32, #tpu.memory_space<vmem>>, vector<1x128xf32>
    %7 = vector.broadcast %6 : vector<1x128xf32> to vector<8x128xf32>
    %8 = arith.addf %5, %7 : vector<8x128xf32>
    %cst_6 = arith.constant 0.000000e+00 : f32
    %9 = vector.broadcast %cst_6 : f32 to vector<8x128xf32>
    %10 = arith.maximumf %8, %9 : vector<8x128xf32>
    %c0_7 = arith.constant 0 : index
    %c0_8 = arith.constant 0 : index
    %11 = vector.load %arg8[%c0_7, %c0_8] : memref<8x128xf32, #tpu.memory_space<vmem>>, vector<8x128xf32>
    %c0_9 = arith.constant 0 : index
    %c0_10 = arith.constant 0 : index
    %12 = vector.load %arg5[%c0_9, %c0_10] : memref<128x128xf32, #tpu.memory_space<vmem>>, vector<128x128xf32>
    %cst_11 = arith.constant dense<0.000000e+00> : vector<8x128xf32>
    %13 = tpu.matmul %10, %12, %cst_11 {dimension_numbers = #tpu.dot_dimension_numbers<[1], [0], [0], [1], [0, 0, 1, 1], [], []>} : vector<8x128xf32>, vector<128x128xf32>, vector<8x128xf32> -> vector<8x128xf32>
    %14 = arith.addf %11, %13 : vector<8x128xf32>
    %c0_12 = arith.constant 0 : index
    %c0_13 = arith.constant 0 : index
    %15 = vector.load %arg8[%c0_12, %c0_13] : memref<8x128xf32, #tpu.memory_space<vmem>>, vector<8x128xf32>
    tpu.vector_store %arg8[%c0_12, %c0_13], %14 {strides = array<i32>} : memref<8x128xf32, #tpu.memory_space<vmem>>, vector<8x128xf32>,
    %c0_i32_14 = arith.constant 0 : i32
    %16 = arith.cmpi eq, %arg1, %c0_i32_14 : i32
    %17 = arith.extui %16 : i1 to i32
    %c0_i32_15 = arith.constant 0 : i32
    %18 = arith.cmpi ne, %17, %c0_i32_15 : i32
    scf.if %18 {
      %c0_16 = arith.constant 0 : index
      %c0_17 = arith.constant 0 : index
      %19 = vector.load %arg8[%c0_16, %c0_17] : memref<8x128xf32, #tpu.memory_space<vmem>>, vector<8x128xf32>
      %c0_18 = arith.constant 0 : index
      %c0_19 = arith.constant 0 : index
      %20 = vector.load %arg6[%c0_18, %c0_19] : memref<1x128xf32, #tpu.memory_space<vmem>>, vector<1x128xf32>
      %21 = vector.broadcast %20 : vector<1x128xf32> to vector<8x128xf32>
      %22 = arith.addf %19, %21 : vector<8x128xf32>
      %c0_20 = arith.constant 0 : index
      %c0_21 = arith.constant 0 : index
      %23 = vector.load %arg7[%c0_20, %c0_21] : memref<8x128xf32, #tpu.memory_space<vmem>>, vector<8x128xf32>
      tpu.vector_store %arg7[%c0_20, %c0_21], %22 {strides = array<i32>} : memref<8x128xf32, #tpu.memory_space<vmem>>, vector<8x128xf32>,
    } else {
    }
    return
  }
  func.func @transform_0(%arg0: i32, %arg1: i32) -> (i32, i32) {
    %c0_i32 = arith.constant 0 : i32
    %c0_i32_0 = arith.constant 0 : i32
    return %arg0, %c0_i32 : i32, i32
  }
  func.func @transform_1(%arg0: i32, %arg1: i32) -> (i32, i32) {
    %c0_i32 = arith.constant 0 : i32
    %c0_i32_0 = arith.constant 0 : i32
    return %c0_i32, %arg1 : i32, i32
  }
  func.func @transform_2(%arg0: i32, %arg1: i32) -> (i32, i32) {
    %c0_i32 = arith.constant 0 : i32
    %c0_i32_0 = arith.constant 0 : i32
    return %c0_i32, %arg1 : i32, i32
  }
  func.func @transform_3(%arg0: i32, %arg1: i32) -> (i32, i32) {
    %c0_i32 = arith.constant 0 : i32
    %c0_i32_0 = arith.constant 0 : i32
    return %arg1, %c0_i32 : i32, i32
  }
  func.func @transform_4(%arg0: i32, %arg1: i32) -> (i32, i32) {
    %c0_i32 = arith.constant 0 : i32
    %c0_i32_0 = arith.constant 0 : i32
    %c0_i32_1 = arith.constant 0 : i32
    return %c0_i32, %c0_i32_0 : i32, i32
  }
  func.func @transform_5(%arg0: i32, %arg1: i32) -> (i32, i32) {
    %c0_i32 = arith.constant 0 : i32
    %c0_i32_0 = arith.constant 0 : i32
    return %arg0, %c0_i32 : i32, i32
  }
}

</mosaic_0001>

<bundles_post_ra>
// kernel: tpu_custom_call.1
= control target key start
LH: loop header
LB: loop body
LE: loop exit
PB: predicated region body
PF: predicated region fallthrough
CT: control target
= control target key end

     0   :  { %10 = vsyncpa [#allocation4], 0  ;;  %s344_s0 = inlined_call_operand.hbm [shape: f32[8,128], index: 0, kind: input, shape index: {}]   ;;  %s345_s1 = inlined_call_operand.hbm [shape: f32[128,128], index: 1, kind: input, shape index: {}]   ;;  %s346_s2 = inlined_call_operand.vmem [shape: f32[1,128], index: 2, kind: input, shape index: {}]   ;;  %s347_s3 = inlined_call_operand.hbm [shape: f32[128,128], index: 3, kind: input, shape index: {}]   ;;  %s348_s4 = inlined_call_operand.vmem [shape: f32[1,128], index: 4, kind: input, shape index: {}]   ;;  %s349_s5 = inlined_call_operand.hbm [shape: f32[8,128], index: 5, kind: output, shape index: {}]  }
   0x1   :  { %11 = vsyncpa [#allocation7], 0  ;;  %s28_s20 = sshll.u32 %s345_s1, 4  ;;  %s29_s20 = int_to_ptr.hbm [resolvable:$true] %s28_s20 }
   0x2   :  { %12 = vsyncpa [#allocation5], 0  ;;  %s290_s21 = smov [#allocation6]   ;;  %s18_s25 = sshll.u32 %s344_s0, 4  ;;  %s19_s25 = int_to_ptr.hbm [resolvable:$true] %s18_s25 }
   0x3   :  { %s30_s22 = sshll.u32 %s290_s21, 4  ;;  %s291_s26 = smov 128   ;;  %s31_s22 = int_to_ptr.vmem [resolvable:$true] %s30_s22 }
   0x4   :  { %s292_s27 = smov 8   ;;  %s293_s28 = smov [#allocation3]  }
   0x5   :  { %36 = dma.hbm_to_vmem [thread:$0]  %s29_s20, 2048, %s31_s22, [#allocation7], %s291_s26, %s291_s26, %s292_s27  }
   0x6   :  { %s20_s29 = sshll.u32 %s293_s28, 4  ;;  %s43_s7 = sshll.u32 %s347_s3, 4  ;;  %s21_s29 = int_to_ptr.vmem [resolvable:$true] %s20_s29  ;;  %s44_s7 = int_to_ptr.hbm [resolvable:$true] %s43_s7 }
   0x7   :  { %23 = dma.hbm_to_vmem [thread:$0]  %s19_s25, 128, %s21_s29, [#allocation4]  }
   0x8   :  { %s294_s1 = smov [#allocation8]  }
   0x9   :  { %s45_s8 = sshll.u32 %s294_s1, 4  ;;  %s46_s8 = int_to_ptr.vmem [resolvable:$true] %s45_s8 }
   0xa   :  { %51 = dma.hbm_to_vmem [thread:$0]  %s44_s7, 2048, %s46_s8, [#allocation7], %s291_s26, %s291_s26, %s292_s27  }
   0xb   :  { %284 = dma.done.wait [#allocation4], 128  }
   0xc   :  { %285 = vsyncadd [#allocation4], 4294967168 }
   0xd   :  { %286 = dma.done.wait [#allocation7], 4096  }
   0xe   :  { %287 = vsyncadd [#allocation7], 4294963200  ;;  %v87_v0 = vld [vmem:[#allocation6 + $0x78] sm:$0xff]  ;;  %v86_v1 = vld [vmem:[#allocation6 + $0x70] sm:$0xff]  ;;  %s295_s11 = smov [#allocation9]   ;;  %s169_s15 = sshll.u32 %s349_s5, 4  ;;  %s170_s15 = int_to_ptr.hbm [resolvable:$true] %s169_s15 }
   0xf   :  { %92 = vmatpush.msra.mxu0 %v87_v0  ;;  %v85_v2 = vld [vmem:[#allocation6 + $0x68] sm:$0xff]  ;;  %v84_v3 = vld [vmem:[#allocation6 + $0x60] sm:$0xff]  ;;  %v129_v4 = vld [vmem:[#allocation8 + $0x78] sm:$0xff]  ;;  %s167_s12 = sshll.u32 %s295_s11, 4  ;;  %s168_s12 = int_to_ptr.vmem [resolvable:$true] %s167_s12 }
  0x10   :  { %v83_v5 = vld [vmem:[#allocation6 + $0x58] sm:$0xff]  ;;  %130 = vmatpush.msra.mxu1 %v129_v4  ;;  %v128_v6 = vld [vmem:[#allocation8 + $0x70] sm:$0xff]  ;;  %v127_v7 = vld [vmem:[#allocation8 + $0x68] sm:$0xff] }
  0x11   :  { %93 = vmatpush.msra.mxu0 %v86_v1  ;;  %v82_v8 = vld [vmem:[#allocation6 + $0x50] sm:$0xff]  ;;  %v126_v9 = vld [vmem:[#allocation8 + $0x60] sm:$0xff]  ;;  %v81_v10 = vld [vmem:[#allocation6 + $0x48] sm:$0xff] }
  0x12   :  { %131 = vmatpush.msra.mxu1 %v128_v6  ;;  %v125_v11 = vld [vmem:[#allocation8 + $0x58] sm:$0xff]  ;;  %v80_v12 = vld [vmem:[#allocation6 + $0x40] sm:$0xff]  ;;  %v124_v13 = vld [vmem:[#allocation8 + $0x50] sm:$0xff] }
  0x13   :  { %94 = vmatpush.msra.mxu0 %v85_v2  ;;  %v79_v14 = vld [vmem:[#allocation6 + $0x38] sm:$0xff]  ;;  %v123_v15 = vld [vmem:[#allocation8 + $0x48] sm:$0xff]  ;;  %v78_v16 = vld [vmem:[#allocation6 + $0x30] sm:$0xff] }
  0x14   :  { %132 = vmatpush.msra.mxu1 %v127_v7  ;;  %v122_v17 = vld [vmem:[#allocation8 + $0x40] sm:$0xff]  ;;  %v77_v18 = vld [vmem:[#allocation6 + $0x28] sm:$0xff]  ;;  %v121_v19 = vld [vmem:[#allocation8 + $0x38] sm:$0xff] }
  0x15   :  { %95 = vmatpush.msra.mxu0 %v84_v3  ;;  %v76_v20 = vld [vmem:[#allocation6 + $0x20] sm:$0xff]  ;;  %v120_v21 = vld [vmem:[#allocation8 + $0x30] sm:$0xff]  ;;  %v75_v22 = vld [vmem:[#allocation6 + $0x18] sm:$0xff] }
  0x16   :  { %133 = vmatpush.msra.mxu1 %v126_v9  ;;  %v119_v23 = vld [vmem:[#allocation8 + $0x28] sm:$0xff]  ;;  %v74_v24 = vld [vmem:[#allocation6 + $0x10] sm:$0xff]  ;;  %v118_v25 = vld [vmem:[#allocation8 + $0x20] sm:$0xff] }
  0x17   :  { %96 = vmatpush.msra.mxu0 %v83_v5  ;;  %v73_v26 = vld [vmem:[#allocation6 + $0x8] sm:$0xff]  ;;  %v117_v27 = vld [vmem:[#allocation8 + $0x18] sm:$0xff]  ;;  %v72_v28 = vld [vmem:[#allocation6] sm:$0xff] }
  0x18   :  { %134 = vmatpush.msra.mxu1 %v125_v11  ;;  %v71_v29 = vld [vmem:[#allocation3] sm:$0xff]  ;;  %v116_v30 = vld [vmem:[#allocation8 + $0x10] sm:$0xff]  ;;  %v115_v31 = vld [vmem:[#allocation8 + $0x8] sm:$0xff] }
  0x19   :  { %97 = vmatpush.msra.mxu0 %v82_v8  ;;  %v114_v32 = vld [vmem:[#allocation8] sm:$0xff]  ;;  %v186_v33 = vld [vmem:[%s346_s2] ss:$0 sm:$0xff] }
  0x1a   :  { %135 = vmatpush.msra.mxu1 %v124_v13  ;;  %v187_v37 = vld [vmem:[%s348_s4] ss:$0 sm:$0xff] }
  0x1b   :  { %98 = vmatpush.msra.mxu0 %v81_v10 }
  0x1c   :  { %136 = vmatpush.msra.mxu1 %v123_v15 }
  0x1d   :  { %99 = vmatpush.msra.mxu0 %v80_v12 }
  0x1e   :  { %137 = vmatpush.msra.mxu1 %v122_v17 }
  0x1f   :  { %100 = vmatpush.msra.mxu0 %v79_v14 }
  0x20   :  { %138 = vmatpush.msra.mxu1 %v121_v19 }
  0x21   :  { %101 = vmatpush.msra.mxu0 %v78_v16 }
  0x22   :  { %139 = vmatpush.msra.mxu1 %v120_v21 }
  0x23   :  { %102 = vmatpush.msra.mxu0 %v77_v18 }
  0x24   :  { %140 = vmatpush.msra.mxu1 %v119_v23 }
  0x25   :  { %103 = vmatpush.msra.mxu0 %v76_v20 }
  0x26   :  { %141 = vmatpush.msra.mxu1 %v118_v25 }
  0x27   :  { %104 = vmatpush.msra.mxu0 %v75_v22 }
  0x28   :  { %142 = vmatpush.msra.mxu1 %v117_v27 }
  0x29   :  { %105 = vmatpush.msra.mxu0 %v74_v24 }
  0x2a   :  { %143 = vmatpush.msra.mxu1 %v116_v30 }
  0x2b   :  { %106 = vmatpush.msra.mxu0 %v73_v26 }
  0x2c   :  { %144 = vmatpush.msra.mxu1 %v115_v31 }
  0x2d   :  { %107 = vmatpush.msra.mxu0 %v72_v28 }
  0x2e   :  { %108 = vmatmul.f32.vlgmr.msra.gmra.mxu0 %v71_v29  ;;  %145 = vmatpush.msra.mxu1 %v114_v32 }
  0xab   :  { %v109_v34 = vpop.f32.mrf.mxu0 }
  0xac   :  { %v110_v35 = vadd.f32 %v186_v33, %v109_v34 }
  0xae   :  { %v112_v36 = vmax.f32 %v110_v35, 0.0 }
  0xb0   :  { %146 = vmatmul.f32.vlgmr.msra.gmra.mxu1 %v112_v36 }
 0x12d   :  { %v147_v38 = vpop.f32.mrf.mxu1 }
 0x12e   :  { %v160_v39 = vadd.f32 %v187_v37, %v147_v38 }
 0x130   :  { %161 = vst [vmem:[#allocation9] sm:$0xff] %v160_v39 }
 0x131   :  { %172 = dma.vmem_to_hbm [thread:$0]  %s168_s12, 128, %s170_s15, [#allocation5]  }
 0x132   :  { %288 = dma.done.wait [#allocation5], 128  }
 0x133   :  { %289 = vsyncadd [#allocation5], 4294967168 }
 0x134   :  { %177 = vsyncpa [#allocation4], 1 }
 0x135   :  { %178 = vsyncpa [#allocation7], 1 }
 0x136   :  { %179 = vsyncpa [#allocation5], 1 }

</bundles_post_ra>
